<compile_context>
chip_gen: v5e
topology: v5e:2x2
jax: 0.10.0
libtpu: 0.0.40
codegen_flags: <defaults>
</compile_context>

<pallas_src>
import functools

import jax
import jax.numpy as jnp
from jax.experimental import pallas as pl
from jax.experimental.pallas import tpu as pltpu

_COS_EPS = 1e-8   # eps used by F.cosine_similarity (norm clamp)


def _ge2e_kernel(params_ref, e_ref, selt_ref, spk_ref, grp_ref, loss_ref, *,
                 m_utt):
    """Gb fused speaker groups -> per-group losses packed into one lane row.

    params_ref : (2,) f32 SMEM (scalar prefetch): [w, b]
    e_ref      : (R, D) f32 VMEM, R = Gb*N*M, rows group/speaker-major
    selt_ref   : (C, R) f32 VMEM, row c = indicator of rows of speaker c
    spk_ref    : (R, C) f32 VMEM, 1 where same group & same speaker
    grp_ref    : (R, C) f32 VMEM, 1 where same group (any speaker)
    loss_ref   : (8, C) f32 VMEM, group losses replicated per speaker column
    (C = Gb*N rounded up to a multiple of 128; padded columns are all-zero.)
    """
    M = m_utt
    e = e_ref[...]                                   # (R, D)
    sel_t = selt_ref[...]                            # (C, R)
    samespk = spk_ref[...]                           # (R, C) in {0,1}
    samegrp = grp_ref[...]                           # (R, C) in {0,1}
    w = params_ref[0]
    b = params_ref[1]
    inv_m1 = 1.0 / (M - 1)

    # --- per-speaker embedding sums for all Gb groups in one MXU pass -------
    sum_e = jnp.dot(sel_t, e, preferred_element_type=jnp.float32)     # (C, D)

    # --- all e . sum_e dot products, lane-packed across groups --------------
    dots = jax.lax.dot_general(
        e, sum_e, dimension_numbers=(((1,), (1,)), ((), ())),
        preferred_element_type=jnp.float32)                           # (R, C)

    # --- the only D-axis reduction: |e_r|^2 ----------------------------------
    ee = jnp.sum(e * e, axis=1, keepdims=True)                        # (R, 1)

    masked = dots * samespk                                           # (R, C)
    es = jnp.sum(masked, axis=1, keepdims=True)     # (R,1) e_r.sum_e[spk(r)]
    css = jnp.sum(masked, axis=0, keepdims=True)    # (1,C) |sum_e_c|^2
    css_row = jnp.sum(css * samespk, axis=1, keepdims=True)           # (R,1)

    # --- cosine denominators via rsqrt (EUP); max(|x|,eps)=sqrt(max(x2,eps2))
    inv_e = jax.lax.rsqrt(jnp.maximum(ee, _COS_EPS * _COS_EPS))       # (R, 1)
    # leave-one-out centroid: uc_r = (sum_e[spk r] - e_r) / (M-1)
    ucsq = (css_row - 2.0 * es + ee) * (inv_m1 * inv_m1)              # (R, 1)
    inv_uc = jax.lax.rsqrt(jnp.maximum(ucsq, _COS_EPS * _COS_EPS))    # (R, 1)
    # centroid_c = sum_e_c / M; the 1/M cancels against dots = M*(e.centroid),
    # but the eps clamp must be applied at the centroid scale -> M*eps.
    m_eps = M * _COS_EPS
    inv_c = jax.lax.rsqrt(jnp.maximum(css, m_eps * m_eps))            # (1, C)

    cos_same = (es - ee) * inv_m1 * inv_e * inv_uc                    # (R, 1)
    cos_diff = dots * inv_e * inv_c                                   # (R, C)

    # +1e-6 applied to every entry (incl. diagonal), matching the reference.
    cos_mat = jnp.where(samespk > 0.0, cos_same, cos_diff) + 1e-6
    sim = w * cos_mat + b                                             # (R, C)
    # Exclude cross-group / padded columns from the softmax; exp(-1e30-m0)=0.
    sim_m = jnp.where(samegrp > 0.0, sim, -1e30)                      # (R, C)

    pos = w * (cos_same + 1e-6) + b                                   # (R, 1)
    # exact, overflow-free rewrite of log(sum(exp(sim), axis=1) + 1e-6)
    m0 = jnp.maximum(jnp.max(sim_m, axis=1, keepdims=True), 0.0)
    neg = m0 + jnp.log(jnp.sum(jnp.exp(sim_m - m0), axis=1, keepdims=True)
                       + 1e-6 * jnp.exp(-m0))                         # (R, 1)

    per_row = neg - pos                                               # (R, 1)
    # Column c (speaker of group g) collects group g's total loss; padded
    # columns stay 0.  Written as a fully aligned tile -> unmasked vst.
    grp_loss = jnp.sum(per_row * samegrp, axis=0, keepdims=True)      # (1, C)
    loss_ref[...] = jnp.broadcast_to(grp_loss, loss_ref.shape)


def _pick_group_batch(G, N, NM, D):
    """Choose Gb (groups per grid step) and the number of grid steps."""
    lane_target = max(1, 128 // max(N, 1))           # fill ~one lane tile
    gb = max(1, min(G, lane_target))

    def est_bytes(g):
        r = g * NM
        c = -(-g * N // 128) * 128
        # 2x-buffered e block + 3 (2x-buffered) constant masks
        # + ~10 live (r, c) f32 intermediates + sum_e + output tile
        return 4 * (2 * r * D + 6 * r * c + 10 * r * c + c * D + 8 * c)

    # Stay well under the smallest default scoped-VMEM limit (16 MiB, v5e).
    while gb > 1 and est_bytes(gb) > 12 * 1024 * 1024:
        gb -= 1
    steps = -(-G // gb)
    gb = -(-G // steps)          # balance groups across steps (less padding)
    return gb, steps


def _ge2e_pallas(e_groups, w, b):
    """e_groups: (G, N, M, D) f32 -> (G,) per-group GE2E losses."""
    G, N, M, D = e_groups.shape
    if M < 2:
        raise ValueError("GE2E loss requires at least 2 utterances per speaker.")
    NM = N * M
    Gb, steps = _pick_group_batch(G, N, NM, D)
    G_pad = steps * Gb

    e_flat = jnp.asarray(e_groups, jnp.float32).reshape(G, NM, D)
    if G_pad != G:
        # Zero groups produce finite garbage losses that are sliced off below.
        e_flat = jnp.concatenate(
            [e_flat, jnp.zeros((G_pad - G, NM, D), jnp.float32)], axis=0)
    e_flat = e_flat.reshape(steps, Gb * NM, D)       # wrapper reshape = plumbing

    R = Gb * NM
    C = -(-Gb * N // 128) * 128                      # lane-padded column count

    # --- constant masks, built once (hoisted out of the kernel body) --------
    r = jnp.arange(R, dtype=jnp.int32)
    c = jnp.arange(C, dtype=jnp.int32)
    spk_r = r // M                                   # global speaker id, row
    grp_r = r // NM                                  # group id, row
    grp_c = c // N                                   # group id, column
    valid_c = c < Gb * N
    samespk = ((spk_r[:, None] == c[None, :]) &
               valid_c[None, :]).astype(jnp.float32)                 # (R, C)
    samegrp = ((grp_r[:, None] == grp_c[None, :]) &
               valid_c[None, :]).astype(jnp.float32)                 # (R, C)
    sel_t = samespk.T                                                  # (C, R)

    params = jnp.stack([jnp.asarray(w, jnp.float32).reshape(()),
                        jnp.asarray(b, jnp.float32).reshape(())])     # (2,) f32

    kernel = functools.partial(_ge2e_kernel, m_utt=M)
    cost = pl.CostEstimate(
        flops=int(steps * 4 * R * C * D),
        transcendentals=int(steps * R * (C + 4)),
        bytes_accessed=int(4 * (steps * R * D + 3 * R * C + steps * 8 * C)))

    out = pl.pallas_call(
        kernel,
        out_shape=jax.ShapeDtypeStruct((steps, 8, C), jnp.float32),
        grid_spec=pltpu.PrefetchScalarGridSpec(
            num_scalar_prefetch=1,                   # [w, b] -> SMEM
            grid=(steps,),
            in_specs=[
                pl.BlockSpec((None, R, D), lambda s, p: (s, 0, 0)),   # e
                # Constant block index -> DMA'd once, reused every step.
                pl.BlockSpec((C, R), lambda s, p: (0, 0)),            # sel_t
                pl.BlockSpec((R, C), lambda s, p: (0, 0)),            # samespk
                pl.BlockSpec((R, C), lambda s, p: (0, 0)),            # samegrp
            ],
            out_specs=pl.BlockSpec((None, 8, C), lambda s, p: (s, 0, 0)),
        ),
        compiler_params=pltpu.CompilerParams(
            dimension_semantics=("parallel",)),      # v7x: TCs split the steps
        cost_estimate=cost,
    )(params, e_flat, sel_t, samespk, samegrp)

    # Group g's loss sits in lane g*N of row 0 of its step's tile.
    per_group = out[:, 0, 0:Gb * N:N]                # (steps, Gb)
    return per_group.reshape(-1)[:G]


def ge2e_loss(embeddings, w, b):
    """embeddings: (N, M, D) f32 -> scalar GE2E loss (GE2ELoss.forward)."""
    e = jnp.asarray(embeddings, jnp.float32)
    return _ge2e_pallas(e[None], w, b)[0]


def ge2e_loss_batched(embeddings, w, b):
    """embeddings: (G, N, M, D) f32 -> (G,) per-group GE2E losses."""
    e = jnp.asarray(embeddings, jnp.float32)
    return _ge2e_pallas(e, w, b)


# --- pure-JAX reference (mirrors the PyTorch code) --------------------------
def _ge2e_ref(e, w, b):
    N, M, D = e.shape
    sum_e = jnp.sum(e, axis=1)
    centroids = sum_e / M
    uc = (sum_e[:, None, :] - e) / (M - 1)

    def cos(a, b_):
        num = jnp.sum(a * b_, axis=-1)
        den = (jnp.maximum(jnp.linalg.norm(a, axis=-1), _COS_EPS) *
               jnp.maximum(jnp.linalg.norm(b_, axis=-1), _COS_EPS))
        return num / den

    cos_same = cos(e, uc)                                            # (N, M)
    cos_diff = cos(e[:, :, None, :], centroids[None, None, :, :])    # (N, M, N)
    i = jnp.arange(N)
    cos_diff = cos_diff.at[i, :, i].set(cos_same)
    cos_diff = cos_diff + 1e-6
    sim = w * cos_diff + b
    pos = sim[i, :, i]
    neg = jnp.log(jnp.sum(jnp.exp(sim), axis=2) + 1e-6)
    return jnp.sum(neg - pos)


if __name__ == "__main__":
    # GE2ELoss.__init__: w = 10.0, b = -5.0 (scalar parameters).
    # NOTE: torch.clamp(self.w, 1e-6) in forward discards its result (no-op),
    # so it is intentionally not applied here.
    w0, b0 = 10.0, -5.0

    N_SPK, M_UTT, D_EMB = 4, 8, 64
    key = jax.random.PRNGKey(0)
    k1, k2, k3 = jax.random.split(key, 3)

    # single group (matches the module's forward)
    embeddings = jax.random.normal(k1, (N_SPK, M_UTT, D_EMB), dtype=jnp.float32)
    loss = jax.block_until_ready(ge2e_loss(embeddings, w0, b0))
    ref = _ge2e_ref(embeddings, jnp.float32(w0), jnp.float32(b0))
    assert jnp.allclose(loss, ref, rtol=2e-3, atol=1e-2), (loss, ref)

    # small batch: one grid step, 3 groups lane-packed together
    G = 3
    emb_b = jax.random.normal(k2, (G, N_SPK, M_UTT, D_EMB), dtype=jnp.float32)
    losses = jax.block_until_ready(ge2e_loss_batched(emb_b, w0, b0))
    refs = jnp.stack([_ge2e_ref(emb_b[g], jnp.float32(w0), jnp.float32(b0))
                      for g in range(G)])
    assert jnp.allclose(losses, refs, rtol=2e-3, atol=1e-2), (losses, refs)

    # larger batch: multi-step grid (Gb=20, 2 steps), dense loss extraction
    G2 = 40
    emb_b2 = jax.random.normal(k3, (G2, N_SPK, M_UTT, D_EMB), dtype=jnp.float32)
    losses2 = jax.block_until_ready(ge2e_loss_batched(emb_b2, w0, b0))
    refs2 = jnp.stack([_ge2e_ref(emb_b2[g], jnp.float32(w0), jnp.float32(b0))
                       for g in range(G2)])
    assert jnp.allclose(losses2, refs2, rtol=2e-3, atol=1e-2), (losses2, refs2)

    print("KERNEL_OK")
</pallas_src>

<mosaic_0001>
module attributes {stable_mosaic.version = 11 : i64} {
  func.func @_ge2e_kernel(%arg0: i32, %arg1: memref<2xf32, #tpu.memory_space<smem>>, %arg2: memref<1x32x64xf32, #tpu.memory_space<vmem>>, %arg3: memref<128x32xf32, #tpu.memory_space<vmem>>, %arg4: memref<32x128xf32, #tpu.memory_space<vmem>>, %arg5: memref<32x128xf32, #tpu.memory_space<vmem>>, %arg6: memref<1x8x128xf32, #tpu.memory_space<vmem>>) attributes {dimension_semantics = [#tpu.dimension_semantics<parallel>], iteration_bounds = array<i64: 1>, scalar_prefetch = 1 : i64, scratch_operands = 0 : i64, tpu.core_type = #tpu.core_type<tc>, window_params = [{transform_indices = @transform_0, window_bounds = array<i64: 1, 32, 64>}, {pipeline_mode = #tpu.pipeline_mode<synchronous>, transform_indices = @transform_1, window_bounds = array<i64: 128, 32>}, {pipeline_mode = #tpu.pipeline_mode<synchronous>, transform_indices = @transform_2, window_bounds = array<i64: 32, 128>}, {pipeline_mode = #tpu.pipeline_mode<synchronous>, transform_indices = @transform_3, window_bounds = array<i64: 32, 128>}, {transform_indices = @transform_4, window_bounds = array<i64: 1, 8, 128>}]} {
    %c0 = arith.constant 0 : index
    %c0_0 = arith.constant 0 : index
    %c0_1 = arith.constant 0 : index
    %0 = vector.load %arg2[%c0, %c0_0, %c0_1] : memref<1x32x64xf32, #tpu.memory_space<vmem>>, vector<1x32x64xf32>
    %1 = vector.shape_cast %0 : vector<1x32x64xf32> to vector<32x64xf32>
    %c0_2 = arith.constant 0 : index
    %c0_3 = arith.constant 0 : index
    %2 = vector.load %arg3[%c0_2, %c0_3] : memref<128x32xf32, #tpu.memory_space<vmem>>, vector<128x32xf32>
    %c0_4 = arith.constant 0 : index
    %c0_5 = arith.constant 0 : index
    %3 = vector.load %arg4[%c0_4, %c0_5] : memref<32x128xf32, #tpu.memory_space<vmem>>, vector<32x128xf32>
    %c0_6 = arith.constant 0 : index
    %c0_7 = arith.constant 0 : index
    %4 = vector.load %arg5[%c0_6, %c0_7] : memref<32x128xf32, #tpu.memory_space<vmem>>, vector<32x128xf32>
    %c0_8 = arith.constant 0 : index
    %5 = memref.load %arg1[%c0_8] : memref<2xf32, #tpu.memory_space<smem>>
    %c1 = arith.constant 1 : index
    %6 = memref.load %arg1[%c1] : memref<2xf32, #tpu.memory_space<smem>>
    %cst = arith.constant dense<0.000000e+00> : vector<128x64xf32>
    %7 = tpu.matmul %2, %1, %cst {dimension_numbers = #tpu.dot_dimension_numbers<[1], [0], [0], [1], [0, 0, 1, 1], [], []>} : vector<128x32xf32>, vector<32x64xf32>, vector<128x64xf32> -> vector<128x64xf32>
    %cst_9 = arith.constant dense<0.000000e+00> : vector<32x128xf32>
    %8 = tpu.matmul %1, %7, %cst_9 {dimension_numbers = #tpu.dot_dimension_numbers<[1], [1], [0], [0], [0, 0, 1, 0], [], []>} : vector<32x64xf32>, vector<128x64xf32>, vector<32x128xf32> -> vector<32x128xf32>
    %9 = arith.mulf %1, %1 : vector<32x64xf32>
    %cst_10 = arith.constant dense<0.000000e+00> : vector<32xf32>
    %10 = vector.multi_reduction <add>, %9, %cst_10 [1] : vector<32x64xf32> to vector<32xf32>
    %11 = vector.shape_cast %10 : vector<32xf32> to vector<32x1xf32>
    %12 = arith.mulf %8, %3 : vector<32x128xf32>
    %cst_11 = arith.constant dense<0.000000e+00> : vector<32xf32>
    %13 = vector.multi_reduction <add>, %12, %cst_11 [1] : vector<32x128xf32> to vector<32xf32>
    %14 = vector.shape_cast %13 : vector<32xf32> to vector<32x1xf32>
    %cst_12 = arith.constant dense<0.000000e+00> : vector<128xf32>
    %15 = vector.multi_reduction <add>, %12, %cst_12 [0] : vector<32x128xf32> to vector<128xf32>
    %16 = vector.shape_cast %15 : vector<128xf32> to vector<1x128xf32>
    %17 = vector.broadcast %16 : vector<1x128xf32> to vector<32x128xf32>
    %18 = arith.mulf %17, %3 : vector<32x128xf32>
    %cst_13 = arith.constant dense<0.000000e+00> : vector<32xf32>
    %19 = vector.multi_reduction <add>, %18, %cst_13 [1] : vector<32x128xf32> to vector<32xf32>
    %20 = vector.shape_cast %19 : vector<32xf32> to vector<32x1xf32>
    %cst_14 = arith.constant 1.000000e-16 : f32
    %21 = vector.broadcast %cst_14 : f32 to vector<32x1xf32>
    %22 = arith.maximumf %11, %21 : vector<32x1xf32>
    %23 = math.rsqrt %22 : vector<32x1xf32>
    %cst_15 = arith.constant 2.000000e+00 : f32
    %24 = vector.broadcast %cst_15 : f32 to vector<32x1xf32>
    %25 = arith.mulf %24, %14 : vector<32x1xf32>
    %26 = arith.subf %20, %25 : vector<32x1xf32>
    %27 = arith.addf %26, %11 : vector<32x1xf32>
    %cst_16 = arith.constant 0.0204081628 : f32
    %28 = vector.broadcast %cst_16 : f32 to vector<32x1xf32>
    %29 = arith.mulf %27, %28 : vector<32x1xf32>
    %cst_17 = arith.constant 1.000000e-16 : f32
    %30 = vector.broadcast %cst_17 : f32 to vector<32x1xf32>
    %31 = arith.maximumf %29, %30 : vector<32x1xf32>
    %32 = math.rsqrt %31 : vector<32x1xf32>
    %cst_18 = arith.constant 6.400000e-15 : f32
    %33 = vector.broadcast %cst_18 : f32 to vector<1x128xf32>
    %34 = arith.maximumf %16, %33 : vector<1x128xf32>
    %35 = math.rsqrt %34 : vector<1x128xf32>
    %36 = arith.subf %14, %11 : vector<32x1xf32>
    %cst_19 = arith.constant 0.142857149 : f32
    %37 = vector.broadcast %cst_19 : f32 to vector<32x1xf32>
    %38 = arith.mulf %36, %37 : vector<32x1xf32>
    %39 = arith.mulf %38, %23 : vector<32x1xf32>
    %40 = arith.mulf %39, %32 : vector<32x1xf32>
    %41 = vector.broadcast %23 : vector<32x1xf32> to vector<32x128xf32>
    %42 = arith.mulf %8, %41 : vector<32x128xf32>
    %43 = vector.broadcast %35 : vector<1x128xf32> to vector<32x128xf32>
    %44 = arith.mulf %42, %43 : vector<32x128xf32>
    %cst_20 = arith.constant 0.000000e+00 : f32
    %45 = vector.broadcast %cst_20 : f32 to vector<32x128xf32>
    %46 = arith.cmpf ogt, %3, %45 : vector<32x128xf32>
    %47 = vector.shape_cast %40 : vector<32x1xf32> to vector<32x1xf32>
    %48 = vector.broadcast %47 : vector<32x1xf32> to vector<32x128xf32>
    %49 = arith.select %46, %48, %44 : vector<32x128xi1>, vector<32x128xf32>
    %cst_21 = arith.constant 9.99999997E-7 : f32
    %50 = vector.broadcast %cst_21 : f32 to vector<32x128xf32>
    %51 = arith.addf %49, %50 : vector<32x128xf32>
    %52 = vector.broadcast %5 : f32 to vector<32x128xf32>
    %53 = arith.mulf %52, %51 : vector<32x128xf32>
    %54 = vector.broadcast %6 : f32 to vector<32x128xf32>
    %55 = arith.addf %53, %54 : vector<32x128xf32>
    %cst_22 = arith.constant 0.000000e+00 : f32
    %56 = vector.broadcast %cst_22 : f32 to vector<32x128xf32>
    %57 = arith.cmpf ogt, %4, %56 : vector<32x128xf32>
    %cst_23 = arith.constant -1.000000e+30 : f32
    %58 = vector.broadcast %cst_23 : f32 to vector<32x128xf32>
    %59 = arith.select %57, %55, %58 : vector<32x128xi1>, vector<32x128xf32>
    %cst_24 = arith.constant 9.99999997E-7 : f32
    %60 = vector.broadcast %cst_24 : f32 to vector<32x1xf32>
    %61 = arith.addf %40, %60 : vector<32x1xf32>
    %62 = vector.broadcast %5 : f32 to vector<32x1xf32>
    %63 = arith.mulf %62, %61 : vector<32x1xf32>
    %64 = vector.broadcast %6 : f32 to vector<32x1xf32>
    %65 = arith.addf %63, %64 : vector<32x1xf32>
    %cst_25 = arith.constant dense<0xFF800000> : vector<32xf32>
    %66 = vector.multi_reduction <maximumf>, %59, %cst_25 [1] : vector<32x128xf32> to vector<32xf32>
    %67 = vector.shape_cast %66 : vector<32xf32> to vector<32x1xf32>
    %cst_26 = arith.constant 0.000000e+00 : f32
    %68 = vector.broadcast %cst_26 : f32 to vector<32x1xf32>
    %69 = arith.maximumf %67, %68 : vector<32x1xf32>
    %70 = vector.broadcast %69 : vector<32x1xf32> to vector<32x128xf32>
    %71 = arith.subf %59, %70 : vector<32x128xf32>
    %72 = math.exp %71 : vector<32x128xf32>
    %cst_27 = arith.constant dense<0.000000e+00> : vector<32xf32>
    %73 = vector.multi_reduction <add>, %72, %cst_27 [1] : vector<32x128xf32> to vector<32xf32>
    %74 = vector.shape_cast %73 : vector<32xf32> to vector<32x1xf32>
    %cst_28 = arith.constant 0.000000e+00 : f32
    %75 = vector.broadcast %cst_28 : f32 to vector<32x1xf32>
    %76 = arith.subf %75, %69 : vector<32x1xf32>
    %77 = math.exp %76 : vector<32x1xf32>
    %cst_29 = arith.constant 9.99999997E-7 : f32
    %78 = vector.broadcast %cst_29 : f32 to vector<32x1xf32>
    %79 = arith.mulf %78, %77 : vector<32x1xf32>
    %80 = arith.addf %74, %79 : vector<32x1xf32>
    %81 = math.log %80 : vector<32x1xf32>
    %82 = arith.addf %69, %81 : vector<32x1xf32>
    %83 = arith.subf %82, %65 : vector<32x1xf32>
    %84 = vector.broadcast %83 : vector<32x1xf32> to vector<32x128xf32>
    %85 = arith.mulf %84, %4 : vector<32x128xf32>
    %cst_30 = arith.constant dense<0.000000e+00> : vector<128xf32>
    %86 = vector.multi_reduction <add>, %85, %cst_30 [0] : vector<32x128xf32> to vector<128xf32>
    %87 = vector.shape_cast %86 : vector<128xf32> to vector<1x128xf32>
    %88 = vector.shape_cast %87 : vector<1x128xf32> to vector<1x128xf32>
    %89 = vector.broadcast %88 : vector<1x128xf32> to vector<8x128xf32>
    %c0_31 = arith.constant 0 : index
    %c0_32 = arith.constant 0 : index
    %c0_33 = arith.constant 0 : index
    %90 = vector.load %arg6[%c0_31, %c0_32, %c0_33] : memref<1x8x128xf32, #tpu.memory_space<vmem>>, vector<1x8x128xf32>
    %91 = vector.shape_cast %90 : vector<1x8x128xf32> to vector<8x128xf32>
    %92 = vector.shape_cast %89 : vector<8x128xf32> to vector<1x8x128xf32>
    tpu.vector_store %arg6[%c0_31, %c0_32, %c0_33], %92 {strides = array<i32>} : memref<1x8x128xf32, #tpu.memory_space<vmem>>, vector<1x8x128xf32>,
    return
  }
  func.func @transform_0(%arg0: i32, %arg1: memref<2xf32, #tpu.memory_space<smem>>) -> (i32, i32, i32) {
    %c0_i32 = arith.constant 0 : i32
    %c0_i32_0 = arith.constant 0 : i32
    %c0_i32_1 = arith.constant 0 : i32
    return %arg0, %c0_i32, %c0_i32_0 : i32, i32, i32
  }
  func.func @transform_1(%arg0: i32, %arg1: memref<2xf32, #tpu.memory_space<smem>>) -> (i32, i32) {
    %c0_i32 = arith.constant 0 : i32
    %c0_i32_0 = arith.constant 0 : i32
    %c0_i32_1 = arith.constant 0 : i32
    return %c0_i32, %c0_i32_0 : i32, i32
  }
  func.func @transform_2(%arg0: i32, %arg1: memref<2xf32, #tpu.memory_space<smem>>) -> (i32, i32) {
    %c0_i32 = arith.constant 0 : i32
    %c0_i32_0 = arith.constant 0 : i32
    %c0_i32_1 = arith.constant 0 : i32
    return %c0_i32, %c0_i32_0 : i32, i32
  }
  func.func @transform_3(%arg0: i32, %arg1: memref<2xf32, #tpu.memory_space<smem>>) -> (i32, i32) {
    %c0_i32 = arith.constant 0 : i32
    %c0_i32_0 = arith.constant 0 : i32
    %c0_i32_1 = arith.constant 0 : i32
    return %c0_i32, %c0_i32_0 : i32, i32
  }
  func.func @transform_4(%arg0: i32, %arg1: memref<2xf32, #tpu.memory_space<smem>>) -> (i32, i32, i32) {
    %c0_i32 = arith.constant 0 : i32
    %c0_i32_0 = arith.constant 0 : i32
    %c0_i32_1 = arith.constant 0 : i32
    return %arg0, %c0_i32, %c0_i32_0 : i32, i32, i32
  }
}

</mosaic_0001>

<bundles_post_ra>
// kernel: tpu_custom_call.1
= control target key start
LH: loop header
LB: loop body
LE: loop exit
PB: predicated region body
PF: predicated region fallthrough
CT: control target
= control target key end

     0   :  { %s730_s21 = smov [#allocation3]   ;;  %s1123_s0 = inlined_call_operand.vmem [shape: f32[2], index: 0, kind: input, shape index: {}]   ;;  %s1124_s1 = inlined_call_operand.vmem [shape: f32[1,32,64], index: 1, kind: input, shape index: {}]   ;;  %s1125_s2 = inlined_call_operand.vmem [shape: f32[128,32], index: 2, kind: input, shape index: {}]   ;;  %s1126_s3 = inlined_call_operand.vmem [shape: f32[32,128], index: 3, kind: input, shape index: {}]   ;;  %s1127_s4 = inlined_call_operand.vmem [shape: f32[32,128], index: 4, kind: input, shape index: {}]   ;;  %s1128_s5 = inlined_call_operand.hbm [shape: f32[1,8,128], index: 5, kind: output, shape index: {}]  }
   0x1   :  { %s11_s20 = sshll.u32 %s1123_s0, 4  ;;  %s12_s20 = int_to_ptr.vmem [resolvable:$true] %s11_s20 }
   0x2   :  { %14 = dma.vmem_to_smem %s12_s20, 16, %s730_s21, [#allocation2] }
   0x3   :  { %726 = dma.done.wait [#allocation2], 16 }
   0x4   :  { %727 = vsyncadd [#allocation2], 4294967280 }
   0x5   :  { %17 = sfence }
   0x6   :  { %v768_v0 = vld [vmem:[%s1124_s1 + $0x18] sm:$0xff]  ;;  %v773_v1 = vld [vmem:[%s1124_s1 + $0x10] sm:$0xff]  ;;  %v780_v2 = vld [vmem:[%s1124_s1 + $0x8] sm:$0xff] }
   0x7   :  { %626 = vmatpush.msra.mxu2 %v768_v0  ;;  %118 = vmatpush.msra.mxu0 %v768_v0 }
   0x9   :  { %627 = vmatpush.msra.mxu2 %v773_v1  ;;  %119 = vmatpush.msra.mxu0 %v773_v1 }
   0xa   :  { %18 = vsyncpa [#allocation5], 0  ;;  %v787_v3 = vld [vmem:[%s1124_s1] sm:$0xff]  ;;  %v38_v4 = vld [vmem:[%s1125_s2 + $0x38] sm:$0xff]  ;;  %vm57_vm0 = vcmask 261120   ;;  %vm171_vm1 = vcmask 523264   ;;  %v262_v37 = vmul.f32 %v780_v2, %v780_v2  ;;  %v263_v54 = vmul.f32 %v773_v1, %v773_v1 }
   0xb   :  { %628 = vmatpush.msra.mxu2 %v780_v2  ;;  %120 = vmatpush.msra.mxu0 %v780_v2  ;;  %v39_v5 = vld [vmem:[%s1125_s2 + $0x40] sm:$0xff]  ;;  %v40_v6 = vld [vmem:[%s1125_s2 + $0x48] sm:$0xff]  ;;  %v41_v7 = vld [vmem:[%s1125_s2 + $0x50] sm:$0xff]  ;;  %v261_v34 = vmul.f32 %v787_v3, %v787_v3  ;;  %s1000_s15 = sld [smem:[#allocation3 + $0x1]]  ;;  %s580_s26 = sshll.u32 %s1128_s5, 4  ;;  %s581_s26 = int_to_ptr.hbm [resolvable:$true] %s580_s26 }
   0xc   :  { %v31_v8 = vld [vmem:[%s1125_s2] sm:$0xff]  ;;  %v42_v9 = vld [vmem:[%s1125_s2 + $0x58] sm:$0xff]  ;;  %v32_v10 = vld [vmem:[%s1125_s2 + $0x8] sm:$0xff]  ;;  %v268_v38 = vsel %vm171_vm1, %v262_v37, 0.0  ;;  %v271_v59 = vsel %vm171_vm1, %v263_v54, 0.0 }
   0xd   :  { %629 = vmatpush.msra.mxu2 %v787_v3  ;;  %121 = vmatpush.msra.mxu0 %v787_v3  ;;  %v43_v11 = vld [vmem:[%s1125_s2 + $0x60] sm:$0xff]  ;;  %v33_v12 = vld [vmem:[%s1125_s2 + $0x10] sm:$0xff]  ;;  %v44_v13 = vld [vmem:[%s1125_s2 + $0x68] sm:$0xff]  ;;  %v265_v35 = vsel %vm171_vm1, %v261_v34, 0.0 }
   0xe   :  { %597 = vmatmul.msk.f32.vlgmr.msra.gmra.mxu2 %vm57_vm0, %v38_v4  ;;  %590 = vmatmul.msk.f32.vlgmr.msra.gmra.mxu0 %vm57_vm0, %v31_v8  ;;  %v34_v14 = vld [vmem:[%s1125_s2 + $0x18] sm:$0xff]  ;;  %v45_v15 = vld [vmem:[%s1125_s2 + $0x70] sm:$0xff]  ;;  %v35_v16 = vld [vmem:[%s1125_s2 + $0x20] sm:$0xff] }
   0xf   :  { %v46_v17 = vld [vmem:[%s1125_s2 + $0x78] sm:$0xff]  ;;  %v36_v18 = vld [vmem:[%s1125_s2 + $0x28] sm:$0xff]  ;;  %v37_v19 = vld [vmem:[%s1125_s2 + $0x30] sm:$0xff]  ;;  %266 = vadd.xlane.f32.xlu2 %v265_v35  ;;  %269 = vadd.xlane.f32.xlu0 %v268_v38 }
  0x10   :  { %v906_v40 = vld [vmem:[%s1126_s3] sm:$0xff]  ;;  %v915_v43 = vld [vmem:[%s1126_s3 + $0x10] sm:$0xff]  ;;  %v922_v45 = vld [vmem:[%s1126_s3 + $0x8] sm:$0xff] }
  0x11   :  { %v938_v53 = vld [vmem:[%s1126_s3 + $0x18] sm:$0xff]  ;;  %s997_s3 = sld [smem:[#allocation3]]  ;;  %vm449_vm13 = vcmp.gt.f32.partialorder %v906_v40, 0.0  ;;  %vm450_vm15 = vcmp.gt.f32.partialorder %v922_v45, 0.0 }
  0x16   :  { %598 = vmatmul.msk.f32.gmra.mxu2 %vm57_vm0, %v39_v5  ;;  %591 = vmatmul.msk.f32.gmra.mxu0 %vm57_vm0, %v32_v10 }
  0x1e   :  { %599 = vmatmul.msk.f32.gmra.mxu2 %vm57_vm0, %v40_v6  ;;  %592 = vmatmul.msk.f32.gmra.mxu0 %vm57_vm0, %v33_v12 }
  0x26   :  { %600 = vmatmul.msk.f32.gmra.mxu2 %vm57_vm0, %v41_v7  ;;  %593 = vmatmul.msk.f32.gmra.mxu0 %vm57_vm0, %v34_v14 }
  0x2e   :  { %601 = vmatmul.msk.f32.gmra.mxu2 %vm57_vm0, %v42_v9  ;;  %594 = vmatmul.msk.f32.gmra.mxu0 %vm57_vm0, %v35_v16 }
  0x36   :  { %602 = vmatmul.msk.f32.gmra.mxu2 %vm57_vm0, %v43_v11  ;;  %595 = vmatmul.msk.f32.gmra.mxu0 %vm57_vm0, %v36_v18 }
  0x3e   :  { %603 = vmatmul.msk.f32.gmra.mxu2 %vm57_vm0, %v44_v13  ;;  %596 = vmatmul.msk.f32.gmra.mxu0 %vm57_vm0, %v37_v19 }
  0x46   :  { %604 = vmatmul.msk.f32.gmra.mxu2 %vm57_vm0, %v45_v15 }
  0x4e   :  { %605 = vmatmul.msk.f32.gmra.mxu2 %vm57_vm0, %v46_v17 }
  0x82   :  { %v928_v48 = vpop.xlane.xlu2 %266  ;;  %v932_v50 = vpop.xlane.xlu0 %269 }
  0x83   :  { %v310_v52 = vmax.f32 %v928_v48, 1e-16  ;;  %v311_v55 = vmax.f32 %v932_v50, 1e-16 }
  0x85   :  { %648 = vrsqrt.f32 %v310_v52  ;;  %vm320_vm2 = vweird.f32 %v310_v52  ;;  %vm330_vm4 = vweird.f32 %v311_v55 }
  0x86   :  { %650 = vrsqrt.f32 %v311_v55 }
  0x8b   :  { %v123_v25 = vpop.f32.mrf.mxu0  ;;  %v649_v63 = vpop.eup %648 }
  0x8c   :  { %vm321_vm3 = vweird.f32 %v649_v63 }
  0x8d   :  { %vm322_vm6 = vmor %vm320_vm2, %vm321_vm3 }
  0x91   :  { %v144_v20 = vpop.f32.mrf.mxu2 }
  0x93   :  { %v126_v28 = vpop.f32.mrf.mxu0 }
  0x99   :  { %v147_v21 = vpop.f32.mrf.mxu2 }
  0x9b   :  { %v129_v30 = vpop.f32.mrf.mxu0 }
  0xa1   :  { %v150_v22 = vpop.f32.mrf.mxu2 }
  0xa3   :  { %v132_v32 = vpop.f32.mrf.mxu0 }
  0xa9   :  { %v153_v23 = vpop.f32.mrf.mxu2 }
  0xab   :  { %v135_v33 = vpop.f32.mrf.mxu0 }
  0xb1   :  { %v156_v24 = vpop.f32.mrf.mxu2 }
  0xb3   :  { %v138_v36 = vpop.f32.mrf.mxu0 }
  0xb9   :  { %v159_v26 = vpop.f32.mrf.mxu2 }
  0xbb   :  { %v141_v39 = vpop.f32.mrf.mxu0 }
  0xc1   :  { %v162_v27 = vpop.f32.mrf.mxu2 }
  0xc9   :  { %v165_v29 = vpop.f32.mrf.mxu2 }
  0xd1   :  { %v168_v31 = vpop.f32.mrf.mxu2 }
  0xd2   :  { %606 = vmatpush.xpose.msk.msra.mxu1 %vm171_vm1, %v168_v31  ;;  %630 = vmatpush.xpose.msk.msra.mxu3 %vm171_vm1, %v168_v31 }
  0xd6   :  { %607 = vmatpush.xpose.msk.msra.mxu1 %vm171_vm1, %v165_v29  ;;  %631 = vmatpush.xpose.msk.msra.mxu3 %vm171_vm1, %v165_v29 }
  0xda   :  { %608 = vmatpush.xpose.msk.msra.mxu1 %vm171_vm1, %v162_v27  ;;  %632 = vmatpush.xpose.msk.msra.mxu3 %vm171_vm1, %v162_v27 }
  0xde   :  { %609 = vmatpush.xpose.msk.msra.mxu1 %vm171_vm1, %v159_v26  ;;  %633 = vmatpush.xpose.msk.msra.mxu3 %vm171_vm1, %v159_v26 }
  0xe2   :  { %610 = vmatpush.xpose.msk.msra.mxu1 %vm171_vm1, %v156_v24  ;;  %634 = vmatpush.xpose.msk.msra.mxu3 %vm171_vm1, %v156_v24 }
  0xe6   :  { %611 = vmatpush.xpose.msk.msra.mxu1 %vm171_vm1, %v153_v23  ;;  %635 = vmatpush.xpose.msk.msra.mxu3 %vm171_vm1, %v153_v23  ;;  %v264_v23 = vmul.f32 %v768_v0, %v768_v0 }
  0xea   :  { %612 = vmatpush.xpose.msk.msra.mxu1 %vm171_vm1, %v150_v22  ;;  %636 = vmatpush.xpose.msk.msra.mxu3 %vm171_vm1, %v150_v22 }
  0xee   :  { %613 = vmatpush.xpose.msk.msra.mxu1 %vm171_vm1, %v147_v21  ;;  %637 = vmatpush.xpose.msk.msra.mxu3 %vm171_vm1, %v147_v21 }
  0xf2   :  { %614 = vmatpush.xpose.msk.msra.mxu1 %vm171_vm1, %v144_v20  ;;  %638 = vmatpush.xpose.msk.msra.mxu3 %vm171_vm1, %v144_v20 }
  0xf6   :  { %615 = vmatpush.xpose.msk.msra.mxu1 %vm171_vm1, %v141_v39  ;;  %639 = vmatpush.xpose.msk.msra.mxu3 %vm171_vm1, %v141_v39 }
  0xfa   :  { %616 = vmatpush.xpose.msk.msra.mxu1 %vm171_vm1, %v138_v36  ;;  %640 = vmatpush.xpose.msk.msra.mxu3 %vm171_vm1, %v138_v36 }
  0xfe   :  { %617 = vmatpush.xpose.msk.msra.mxu1 %vm171_vm1, %v135_v33  ;;  %641 = vmatpush.xpose.msk.msra.mxu3 %vm171_vm1, %v135_v33 }
 0x102   :  { %618 = vmatpush.xpose.msk.msra.mxu1 %vm171_vm1, %v132_v32  ;;  %642 = vmatpush.xpose.msk.msra.mxu3 %vm171_vm1, %v132_v32 }
 0x106   :  { %619 = vmatpush.xpose.msk.msra.mxu1 %vm171_vm1, %v129_v30  ;;  %643 = vmatpush.xpose.msk.msra.mxu3 %vm171_vm1, %v129_v30 }
 0x10a   :  { %620 = vmatpush.xpose.msk.msra.mxu1 %vm171_vm1, %v126_v28  ;;  %644 = vmatpush.xpose.msk.msra.mxu3 %vm171_vm1, %v126_v28  ;;  %v274_v28 = vsel %vm171_vm1, %v264_v23, 0.0 }
 0x10e   :  { %621 = vmatpush.xpose.msk.msra.mxu1 %vm171_vm1, %v123_v25  ;;  %645 = vmatpush.xpose.msk.msra.mxu3 %vm171_vm1, %v123_v25 }
 0x111   :  { %622 = vmatmul.msk.f32.vlgmr.msra.gmra.mxu1 %vm171_vm1, %v787_v3  ;;  %624 = vmatmul.msk.f32.vlgmr.msra.gmra.mxu3 %vm171_vm1, %v773_v1  ;;  %v315_v3 = vmul.f32 %v649_v63, %v310_v52 }
 0x113   :  { %v316_v7 = vmul.f32 %v649_v63, %v315_v3 }
 0x115   :  { %v317_v13 = vmul.f32 0.5, %v316_v7 }
 0x117   :  { %v318_v15 = vsub.f32 1.5, %v317_v13 }
 0x119   :  { %623 = vmatmul.msk.f32.gmra.mxu1 %vm171_vm1, %v780_v2  ;;  %625 = vmatmul.msk.f32.gmra.mxu3 %vm171_vm1, %v768_v0  ;;  %v651_v2 = vpop.eup %650  ;;  %v319_v21 = vmul.f32 %v649_v63, %v318_v15 }
 0x11a   :  { %v325_v5 = vmul.f32 %v651_v2, %v311_v55  ;;  %vm331_vm5 = vweird.f32 %v651_v2 }
 0x11b   :  { %vm332_vm7 = vmor %vm330_vm4, %vm331_vm5  ;;  %v954_v26 = vsel %vm322_vm6, %v649_v63, %v319_v21 }
 0x11c   :  { %v326_v9 = vmul.f32 %v651_v2, %v325_v5 }
 0x11e   :  { %v327_v14 = vmul.f32 0.5, %v326_v9 }
 0x120   :  { %v328_v16 = vsub.f32 1.5, %v327_v14 }
 0x122   :  { %v329_v22 = vmul.f32 %v651_v2, %v328_v16 }
 0x124   :  { %v956_v27 = vsel %vm332_vm7, %v651_v2, %v329_v22 }
 0x18e   :  { %v908_v41 = vpop.f32.mrf.mxu1 }
 0x18f   :  { %v277_v42 = vmul.f32 %v908_v41, %v906_v40  ;;  %v441_v31 = vmul.f32 %v954_v26, %v908_v41 }
 0x191   :  { %281 = vadd.xlane.f32.xlu0 %v277_v42 }
 0x194   :  { %v917_v44 = vpop.f32.mrf.mxu3 }
 0x195   :  { %v279_v46 = vmul.f32 %v917_v44, %v915_v43 }
 0x196   :  { %v926_v47 = vpop.f32.mrf.mxu1 }
 0x197   :  { %v278_v49 = vmul.f32 %v926_v47, %v922_v45  ;;  %285 = vadd.xlane.f32.xlu1 %v279_v46  ;;  %v442_v32 = vmul.f32 %v956_v27, %v926_v47 }
 0x199   :  { %v289_v51 = vadd.f32 %v278_v49, %v277_v42  ;;  %283 = vadd.xlane.f32.xlu0 %v278_v49 }
 0x19b   :  { %v290_v57 = vadd.f32 %v289_v51, %v279_v46 }
 0x19c   :  { %v943_v56 = vpop.f32.mrf.mxu3 }
 0x19d   :  { %v280_v58 = vmul.f32 %v943_v56, %v938_v53 }
 0x19f   :  { %v291_v60 = vadd.f32 %v290_v57, %v280_v58  ;;  %287 = vadd.xlane.f32.xlu1 %v280_v58 }
 0x1a1   :  { %v292_v61 = vrot.slane %v291_v60, 4  ;;  %272 = vadd.xlane.f32.xlu0 %v271_v59 }
 0x1a3   :  { %v293_v62 = vadd.f32 %v292_v61, %v291_v60 }
 0x1a5   :  { %v294_v1 = vrot.slane %v293_v62, 2 }
 0x1a7   :  { %v295_v4 = vadd.f32 %v294_v1, %v293_v62 }
 0x1a9   :  { %v296_v6 = vrot.slane %v295_v4, 1 }
 0x1ab   :  { %v297_v8 = vadd.f32 %v296_v6, %v295_v4 }
 0x1ad   :  { %v414_v10 = vmax.f32 %v297_v8, 6.4e-15  ;;  %v299_v11 = vmul.f32 %v297_v8, %v922_v45  ;;  %v298_v12 = vmul.f32 %v297_v8, %v906_v40  ;;  %v300_v18 = vmul.f32 %v297_v8, %v915_v43 }
 0x1ae   :  { %v301_v19 = vmul.f32 %v297_v8, %v938_v53 }
 0x1af   :  { %652 = vrsqrt.f32 %v414_v10  ;;  %304 = vadd.xlane.f32.xlu2 %v299_v11  ;;  %302 = vadd.xlane.f32.xlu1 %v298_v12  ;;  %vm421_vm9 = vweird.f32 %v414_v10 }
 0x1b5   :  { %v653_v17 = vpop.eup %652 }
 0x1b6   :  { %v416_v20 = vmul.f32 %v653_v17, %v414_v10  ;;  %vm422_vm8 = vweird.f32 %v653_v17 }
 0x1b7   :  { %306 = vadd.xlane.f32.xlu2 %v300_v18  ;;  %308 = vadd.xlane.f32.xlu1 %v301_v19  ;;  %vm423_vm10 = vmor %vm421_vm9, %vm422_vm8  ;;  %vm451_vm8 = vcmp.gt.f32.partialorder %v915_v43, 0.0 }
 0x1b8   :  { %v417_v24 = vmul.f32 %v653_v17, %v416_v20 }
 0x1ba   :  { %v418_v25 = vmul.f32 0.5, %v417_v24 }
 0x1bc   :  { %v419_v29 = vsub.f32 1.5, %v418_v25 }
 0x1be   :  { %v420_v30 = vmul.f32 %v653_v17, %v419_v29 }
 0x1bf   :  { %275 = vadd.xlane.f32.xlu2 %v274_v28 }
 0x1c0   :  { %v963_v0 = vsel %vm423_vm10, %v653_v17, %v420_v30 }
 0x1c1   :  { %v966_v33 = vmul.f32 %v442_v32, %v963_v0  ;;  %v969_v34 = vmul.f32 %v441_v31, %v963_v0 }
 0x204   :  { %v282_v35 = vpop.xlane.xlu0 %281 }
 0x205   :  { %v354_v42 = vmul.f32 2.0, %v282_v35  ;;  %v425_v7 = vsub.f32 %v282_v35, %v928_v48 }
 0x207   :  { %v429_v18 = vmul.f32 0.14285715, %v425_v7 }
 0x209   :  { %v433_v31 = vmul.f32 %v429_v18, %v954_v26 }
 0x20a   :  { %v971_v37 = vpop.xlane.xlu1 %285 }
 0x20b   :  { %v356_v63 = vmul.f32 2.0, %v971_v37 }
 0x20c   :  { %v284_v36 = vpop.xlane.xlu0 %283 }
 0x20d   :  { %v355_v46 = vmul.f32 2.0, %v284_v36  ;;  %v426_v11 = vsub.f32 %v284_v36, %v932_v50 }
 0x20f   :  { %v430_v21 = vmul.f32 0.14285715, %v426_v11 }
 0x211   :  { %v434_v35 = vmul.f32 %v430_v21, %v956_v27  ;;  %v1022_v27 = vld [vmem:[%s1127_s4] sm:$0xff] }
 0x212   :  { %v976_v41 = vpop.xlane.xlu1 %287  ;;  %vm471_vm7 = vcmp.gt.f32.partialorder %v1022_v27, 0.0 }
 0x213   :  { %v357_v8 = vmul.f32 2.0, %v976_v41 }
 0x214   :  { %v973_v38 = vpop.xlane.xlu0 %272 }
 0x215   :  { %v312_v39 = vmax.f32 %v973_v38, 1e-16  ;;  %v427_v25 = vsub.f32 %v971_v37, %v973_v38  ;;  %v1015_v37 = vld [vmem:[%s1127_s4 + $0x8] sm:$0xff] }
 0x216   :  { %vm472_vm6 = vcmp.gt.f32.partialorder %v1015_v37, 0.0 }
 0x217   :  { %654 = vrsqrt.f32 %v312_v39  ;;  %vm340_vm11 = vweird.f32 %v312_v39 }
 0x21d   :  { %v655_v51 = vpop.eup %654 }
 0x21e   :  { %v335_v58 = vmul.f32 %v655_v51, %v312_v39  ;;  %vm341_vm12 = vweird.f32 %v655_v51 }
 0x21f   :  { %vm342_vm14 = vmor %vm340_vm11, %vm341_vm12 }
 0x220   :  { %v336_v2 = vmul.f32 %v655_v51, %v335_v58 }
 0x222   :  { %v305_v47 = vpop.xlane.xlu2 %304  ;;  %v303_v49 = vpop.xlane.xlu1 %302  ;;  %v337_v4 = vmul.f32 0.5, %v336_v2 }
 0x223   :  { %v359_v52 = vsub.f32 %v305_v47, %v355_v46  ;;  %v358_v54 = vsub.f32 %v303_v49, %v354_v42  ;;  %v431_v42 = vmul.f32 0.14285715, %v427_v25 }
 0x224   :  { %v338_v14 = vsub.f32 1.5, %v337_v4 }
 0x225   :  { %v363_v55 = vadd.f32 %v359_v52, %v932_v50  ;;  %v362_v57 = vadd.f32 %v358_v54, %v928_v48  ;;  %v1028_v52 = vstv %s997_s3 }
 0x226   :  { %v339_v24 = vmul.f32 %v655_v51, %v338_v14 }
 0x227   :  { %v367_v59 = vmul.f32 0.020408163, %v363_v55  ;;  %v366_v60 = vmul.f32 0.020408163, %v362_v57  ;;  %v1033_v55 = vstv %s1000_s15 }
 0x228   :  { %v343_v39 = vsel %vm342_vm14, %v655_v51, %v339_v24 }
 0x229   :  { %v371_v61 = vmax.f32 %v367_v59, 1e-16  ;;  %v980_v62 = vmax.f32 %v366_v60, 1e-16  ;;  %v443_v57 = vmul.f32 %v343_v39, %v917_v44 }
 0x22a   :  { %v307_v1 = vpop.xlane.xlu2 %306  ;;  %v309_v6 = vpop.xlane.xlu1 %308 }
 0x22b   :  { %656 = vrsqrt.f32 %v371_v61  ;;  %v360_v3 = vsub.f32 %v307_v1, %v356_v63  ;;  %v361_v12 = vsub.f32 %v309_v6, %v357_v8  ;;  %vm390_vm2 = vweird.f32 %v371_v61 }
 0x22c   :  { %658 = vrsqrt.f32 %v980_v62  ;;  %vm380_vm4 = vweird.f32 %v980_v62 }
 0x22d   :  { %v364_v5 = vadd.f32 %v360_v3, %v973_v38 }
 0x22f   :  { %v368_v9 = vmul.f32 0.020408163, %v364_v5 }
 0x231   :  { %v657_v10 = vpop.eup %656  ;;  %v988_v16 = vmax.f32 %v368_v9, 1e-16 }
 0x232   :  { %v659_v13 = vpop.eup %658  ;;  %v385_v15 = vmul.f32 %v657_v10, %v371_v61  ;;  %v990_v17 = vpop.xlane.xlu2 %275  ;;  %vm391_vm0 = vweird.f32 %v657_v10 }
 0x233   :  { %v375_v19 = vmul.f32 %v659_v13, %v980_v62  ;;  %v994_v20 = vmax.f32 %v990_v17, 1e-16  ;;  %v365_v48 = vadd.f32 %v361_v12, %v990_v17  ;;  %660 = vrsqrt.f32 %v988_v16  ;;  %vm392_vm3 = vmor %vm390_vm2, %vm391_vm0 }
 0x234   :  { %v386_v50 = vmul.f32 %v657_v10, %v385_v15  ;;  %vm381_vm1 = vweird.f32 %v659_v13  ;;  %vm400_vm9 = vweird.f32 %v988_v16  ;;  %v428_v62 = vsub.f32 %v976_v41, %v990_v17 }
 0x235   :  { %v376_v22 = vmul.f32 %v659_v13, %v375_v19  ;;  %662 = vrsqrt.f32 %v994_v20  ;;  %v369_v23 = vmul.f32 0.020408163, %v365_v48  ;;  %vm382_vm5 = vmor %vm380_vm4, %vm381_vm1  ;;  %vm350_vm12 = vweird.f32 %v994_v20 }
 0x236   :  { %v387_v28 = vmul.f32 0.5, %v386_v50  ;;  %v435_v19 = vmul.f32 %v431_v42, %v343_v39  ;;  %v432_v24 = vmul.f32 0.14285715, %v428_v62  ;;  %vm452_vm2 = vcmp.gt.f32.partialorder %v938_v53, 0.0 }
 0x237   :  { %v377_v29 = vmul.f32 0.5, %v376_v22  ;;  %v1006_v30 = vmax.f32 %v369_v23, 1e-16  ;;  %v447_v23 = vmul.f32 %v443_v57, %v963_v0 }
 0x238   :  { %v388_v32 = vsub.f32 1.5, %v387_v28 }
 0x239   :  { %v378_v36 = vsub.f32 1.5, %v377_v29  ;;  %664 = vrsqrt.f32 %v1006_v30  ;;  %v1017_v38 = vpop.eup %660  ;;  %vm410_vm0 = vweird.f32 %v1006_v30 }
 0x23a   :  { %v389_v26 = vmul.f32 %v657_v10, %v388_v32  ;;  %v395_v49 = vmul.f32 %v1017_v38, %v988_v16  ;;  %vm401_vm10 = vweird.f32 %v1017_v38 }
 0x23b   :  { %v663_v46 = vpop.eup %662  ;;  %v379_v47 = vmul.f32 %v659_v13, %v378_v36 }
 0x23c   :  { %v393_v54 = vsel %vm392_vm3, %v657_v10, %v389_v26  ;;  %v345_v51 = vmul.f32 %v663_v46, %v994_v20  ;;  %v396_v59 = vmul.f32 %v1017_v38, %v395_v49  ;;  %vm351_vm11 = vweird.f32 %v663_v46 }
 0x23d   :  { %v383_v58 = vsel %vm382_vm5, %v659_v13, %v379_v47  ;;  %v438_v60 = vmul.f32 %v434_v35, %v393_v54  ;;  %vm352_vm14 = vmor %vm350_vm12, %vm351_vm11  ;;  %v1103_v54 = vld [vmem:[%s1127_s4 + $0x18] sm:$0xff] }
 0x23e   :  { %v346_v61 = vmul.f32 %v663_v46, %v345_v51  ;;  %v437_v63 = vmul.f32 %v433_v31, %v383_v58  ;;  %v397_v1 = vmul.f32 0.5, %v396_v59  ;;  %vm474_vm4 = vcmp.gt.f32.partialorder %v1103_v54, 0.0 }
 0x23f   :  { %v665_v2 = vpop.eup %664  ;;  %v454_v44 = vsel %vm450_vm15, %v438_v60, %v966_v33  ;;  %v480_v3 = vadd.f32 1e-06, %v438_v60 }
 0x240   :  { %v347_v4 = vmul.f32 0.5, %v346_v61  ;;  %v405_v5 = vmul.f32 %v665_v2, %v1006_v30  ;;  %v458_v6 = vadd.f32 1e-06, %v454_v44  ;;  %v398_v7 = vsub.f32 1.5, %v397_v1 }
 0x241   :  { %v453_v41 = vsel %vm449_vm13, %v437_v63, %v969_v34  ;;  %v484_v8 = vmul.f32 %v480_v3, %v1028_v52  ;;  %v479_v9 = vadd.f32 1e-06, %v437_v63  ;;  %vm1063_vm13 = vmor %vm400_vm9, %vm401_vm10  ;;  %vm411_vm15 = vweird.f32 %v665_v2 }
 0x242   :  { %v348_v10 = vsub.f32 1.5, %v347_v4  ;;  %v406_v11 = vmul.f32 %v665_v2, %v405_v5  ;;  %v463_v12 = vmul.f32 %v1028_v52, %v458_v6  ;;  %v457_v45 = vadd.f32 1e-06, %v453_v41  ;;  %vm412_vm1 = vmor %vm410_vm0, %vm411_vm15 }
 0x243   :  { %v399_v33 = vmul.f32 %v1017_v38, %v398_v7  ;;  %v1056_v13 = vadd.f32 %v484_v8, %v1033_v55  ;;  %v483_v14 = vmul.f32 %v479_v9, %v1028_v52 }
 0x244   :  { %v349_v34 = vmul.f32 %v663_v46, %v348_v10  ;;  %v407_v15 = vmul.f32 0.5, %v406_v11  ;;  %v468_v17 = vadd.f32 %v1033_v55, %v463_v12  ;;  %v462_v18 = vmul.f32 %v1028_v52, %v457_v45 }
 0x245   :  { %v403_v20 = vsel %vm1063_vm13, %v1017_v38, %v399_v33  ;;  %v1074_v16 = vadd.f32 %v483_v14, %v1033_v55 }
 0x246   :  { %v353_v48 = vsel %vm352_vm14, %v663_v46, %v349_v34  ;;  %v408_v50 = vsub.f32 1.5, %v407_v15  ;;  %v476_v21 = vsel %vm472_vm6, %v468_v17, -1e+30  ;;  %v467_v22 = vadd.f32 %v1033_v55, %v462_v18 }
 0x247   :  { %v444_v25 = vmul.f32 %v353_v48, %v943_v56  ;;  %493 = vmax.xlane.f32.xlu1 %v476_v21  ;;  %v439_v28 = vmul.f32 %v435_v19, %v403_v20  ;;  %v436_v32 = vmul.f32 %v432_v24, %v353_v48  ;;  %v1090_v56 = vld [vmem:[%s1127_s4 + $0x10] sm:$0xff]  ;;  %s731_s4 = smov [#allocation4]  }
 0x248   :  { %v409_v29 = vmul.f32 %v665_v2, %v408_v50  ;;  %v475_v31 = vsel %vm471_vm7, %v467_v22, -1e+30  ;;  %vm473_vm3 = vcmp.gt.f32.partialorder %v1090_v56, 0.0  ;;  %s578_s24 = sshll.u32 %s731_s4, 4  ;;  %s579_s24 = int_to_ptr.vmem [resolvable:$true] %s578_s24 }
 0x249   :  { %491 = vmax.xlane.f32.xlu0 %v475_v31  ;;  %v455_v35 = vsel %vm451_vm8, %v439_v28, %v447_v23  ;;  %v481_v36 = vadd.f32 1e-06, %v439_v28  ;;  %v448_v42 = vmul.f32 %v444_v25, %v963_v0 }
 0x24a   :  { %v413_v38 = vsel %vm412_vm1, %v665_v2, %v409_v29  ;;  %v459_v39 = vadd.f32 1e-06, %v455_v35 }
 0x24b   :  { %v440_v30 = vmul.f32 %v436_v32, %v413_v38  ;;  %v485_v26 = vmul.f32 %v481_v36, %v1028_v52 }
 0x24c   :  { %v464_v46 = vmul.f32 %v1028_v52, %v459_v39 }
 0x24d   :  { %v482_v47 = vadd.f32 1e-06, %v440_v30  ;;  %v456_v43 = vsel %vm452_vm2, %v440_v30, %v448_v42  ;;  %v1097_v53 = vadd.f32 %v485_v26, %v1033_v55 }
 0x24e   :  { %v469_v49 = vadd.f32 %v1033_v55, %v464_v46  ;;  %v460_v51 = vadd.f32 1e-06, %v456_v43 }
 0x24f   :  { %v486_v0 = vmul.f32 %v482_v47, %v1028_v52 }
 0x250   :  { %v477_v57 = vsel %vm473_vm3, %v469_v49, -1e+30  ;;  %v465_v58 = vmul.f32 %v1028_v52, %v460_v51 }
 0x251   :  { %495 = vmax.xlane.f32.xlu2 %v477_v57  ;;  %v1109_v59 = vadd.f32 %v486_v0, %v1033_v55 }
 0x252   :  { %v470_v60 = vadd.f32 %v1033_v55, %v465_v58 }
 0x254   :  { %v478_v61 = vsel %vm474_vm4, %v470_v60, -1e+30 }
 0x255   :  { %497 = vmax.xlane.f32.xlu0 %v478_v61 }
 0x2ba   :  { %v494_v62 = vpop.xlane.xlu1 %493 }
 0x2bb   :  { %v500_v63 = vmax.f32 %v494_v62, 0.0 }
 0x2bc   :  { %v492_v2 = vpop.xlane.xlu0 %491 }
 0x2bd   :  { %v499_v1 = vmax.f32 %v492_v2, 0.0  ;;  %v504_v44 = vsub.f32 %v476_v21, %v500_v63  ;;  %v524_v14 = vsub.f32 0.0, %v500_v63 }
 0x2bf   :  { %v503_v3 = vsub.f32 %v475_v31, %v499_v1  ;;  %v509_v4 = vmul.f32 1.442695, %v504_v44  ;;  %v523_v40 = vsub.f32 0.0, %v499_v1  ;;  %v529_v34 = vmul.f32 1.442695, %v524_v14 }
 0x2c1   :  { %v507_v5 = vmul.f32 1.442695, %v503_v3  ;;  %666 = vpow2.f32 %v509_v4  ;;  %v527_v15 = vmul.f32 1.442695, %v523_v40 }
 0x2c3   :  { %668 = vpow2.f32 %v507_v5 }
 0x2c4   :  { %v496_v52 = vpop.xlane.xlu2 %495 }
 0x2c5   :  { %v501_v6 = vmax.f32 %v496_v52, 0.0 }
 0x2c7   :  { %v667_v7 = vpop.eup %666  ;;  %v505_v41 = vsub.f32 %v477_v57, %v501_v6  ;;  %v525_v17 = vsub.f32 0.0, %v501_v6 }
 0x2c8   :  { %v498_v8 = vpop.xlane.xlu0 %497  ;;  %517 = vadd.xlane.f32.xlu2 %v667_v7 }
 0x2c9   :  { %v669_v9 = vpop.eup %668  ;;  %v511_v55 = vmul.f32 1.442695, %v505_v41  ;;  %v502_v10 = vmax.f32 %v498_v8, 0.0  ;;  %v531_v20 = vmul.f32 1.442695, %v525_v17 }
 0x2ca   :  { %515 = vadd.xlane.f32.xlu1 %v669_v9 }
 0x2cb   :  { %670 = vpow2.f32 %v511_v55  ;;  %v506_v11 = vsub.f32 %v478_v61, %v502_v10  ;;  %v526_v19 = vsub.f32 0.0, %v502_v10 }
 0x2cd   :  { %v513_v12 = vmul.f32 1.442695, %v506_v11  ;;  %v533_v22 = vmul.f32 1.442695, %v526_v19 }
 0x2cf   :  { %672 = vpow2.f32 %v513_v12 }
 0x2d0   :  { %674 = vpow2.f32 %v529_v34 }
 0x2d1   :  { %v671_v45 = vpop.eup %670  ;;  %676 = vpow2.f32 %v527_v15 }
 0x2d2   :  { %519 = vadd.xlane.f32.xlu0 %v671_v45  ;;  %678 = vpow2.f32 %v531_v20 }
 0x2d5   :  { %v673_v33 = vpop.eup %672 }
 0x2d6   :  { %521 = vadd.xlane.f32.xlu1 %v673_v33  ;;  %v675_v18 = vpop.eup %674 }
 0x2d7   :  { %v677_v48 = vpop.eup %676  ;;  %v536_v50 = vmul.f32 1e-06, %v675_v18 }
 0x2d8   :  { %v535_v24 = vmul.f32 1e-06, %v677_v48  ;;  %v679_v29 = vpop.eup %678 }
 0x2d9   :  { %v537_v32 = vmul.f32 1e-06, %v679_v29 }
 0x33b   :  { %v518_v21 = vpop.xlane.xlu2 %517 }
 0x33c   :  { %v540_v23 = vadd.f32 %v536_v50, %v518_v21 }
 0x33d   :  { %v516_v25 = vpop.xlane.xlu1 %515 }
 0x33e   :  { %680 = vlog2.f32 %v540_v23  ;;  %v539_v28 = vadd.f32 %v535_v24, %v516_v25 }
 0x33f   :  { %682 = vpow2.f32 %v533_v22 }
 0x340   :  { %684 = vlog2.f32 %v539_v28 }
 0x344   :  { %v681_v31 = vpop.eup %680 }
 0x345   :  { %v683_v35 = vpop.eup %682  ;;  %v546_v36 = vmul.f32 0.6931472, %v681_v31  ;;  %v520_v38 = vpop.xlane.xlu0 %519 }
 0x346   :  { %v685_v39 = vpop.eup %684  ;;  %v541_v30 = vadd.f32 %v537_v32, %v520_v38  ;;  %v538_v46 = vmul.f32 1e-06, %v683_v35 }
 0x347   :  { %v552_v42 = vadd.f32 %v546_v36, %v500_v63  ;;  %v544_v26 = vmul.f32 0.6931472, %v685_v39 }
 0x348   :  { %686 = vlog2.f32 %v541_v30 }
 0x349   :  { %v556_v47 = vsub.f32 %v552_v42, %v1056_v13  ;;  %v551_v43 = vadd.f32 %v544_v26, %v499_v1  ;;  %v522_v49 = vpop.xlane.xlu1 %521 }
 0x34a   :  { %v542_v51 = vadd.f32 %v538_v46, %v522_v49 }
 0x34b   :  { %v560_v0 = vmul.f32 %v556_v47, %v1015_v37  ;;  %v555_v57 = vsub.f32 %v551_v43, %v1074_v16 }
 0x34c   :  { %688 = vlog2.f32 %v542_v51 }
 0x34d   :  { %v559_v58 = vmul.f32 %v555_v57, %v1022_v27 }
 0x34e   :  { %v687_v60 = vpop.eup %686 }
 0x34f   :  { %v563_v61 = vadd.f32 %v560_v0, %v559_v58  ;;  %v548_v62 = vmul.f32 0.6931472, %v687_v60 }
 0x351   :  { %v553_v2 = vadd.f32 %v548_v62, %v501_v6 }
 0x352   :  { %v689_v63 = vpop.eup %688 }
 0x353   :  { %v557_v44 = vsub.f32 %v553_v2, %v1097_v53  ;;  %v550_v3 = vmul.f32 0.6931472, %v689_v63 }
 0x355   :  { %v561_v13 = vmul.f32 %v557_v44, %v1090_v56  ;;  %v554_v1 = vadd.f32 %v550_v3, %v502_v10 }
 0x357   :  { %v564_v4 = vadd.f32 %v563_v61, %v561_v13  ;;  %v558_v5 = vsub.f32 %v554_v1, %v1109_v59 }
 0x359   :  { %v562_v37 = vmul.f32 %v558_v5, %v1103_v54 }
 0x35b   :  { %v565_v16 = vadd.f32 %v564_v4, %v562_v37 }
 0x35d   :  { %v566_v52 = vrot.slane %v565_v16, 4 }
 0x35f   :  { %v567_v7 = vadd.f32 %v566_v52, %v565_v16 }
 0x361   :  { %v568_v27 = vrot.slane %v567_v7, 2 }
 0x363   :  { %v569_v41 = vadd.f32 %v568_v27, %v567_v7 }
 0x365   :  { %v570_v53 = vrot.slane %v569_v41, 1 }
 0x367   :  { %v571_v6 = vadd.f32 %v570_v53, %v569_v41 }
 0x369   :  { %572 = vst [vmem:[#allocation4] sm:$0xff] %v571_v6 }
 0x36a   :  { %583 = dma.vmem_to_hbm [thread:$0]  %s579_s24, 128, %s581_s26, [#allocation5]  }
 0x36b   :  { %728 = dma.done.wait [#allocation5], 128  }
 0x36c   :  { %729 = vsyncadd [#allocation5], 4294967168 }
 0x36d   :  { %588 = vsyncpa [#allocation5], 1 }

</bundles_post_ra>
